<compile_context>
chip_gen: v6e
topology: v6e:2x2x1
jax: 0.10.0
libtpu: 0.0.40
codegen_flags: <defaults>
</compile_context>

<pallas_src>
import jax
import jax.numpy as jnp
from jax import lax
from jax.experimental import pallas as pl
from jax.experimental.pallas import tpu as pltpu

# ----- module hyperparameters (consistent with the PyTorch module) -----
N_EMBD = 384                      # fixed by the module
NUM_HEADS = 6
HEAD_SIZE = N_EMBD // NUM_HEADS   # 64
BATCH = 2
SEQ = 16                          # T <= block_size (256)


def fused_mha_kernel(x_ref, wqkv_ref, wproj_ref, bproj_ref, o_ref, acc_ref):
    """One (batch, head) step of fused causal multi-head attention.

    x_ref    : (1, T, C)     f32   current batch's activations
    wqkv_ref : (1, C, 3*hs)  bf16  this head's [Q | K | V] projection columns
    wproj_ref: (1, hs, C)    bf16  this head's rows of the output projection
    bproj_ref: (1, C)        f32   output projection bias
    o_ref    : (1, T, C)     f32   output block (written on the last head)
    acc_ref  : (T, C)        f32   scratch accumulator for the projected output
    """
    h = pl.program_id(1)
    n_heads = pl.num_programs(1)
    T = x_ref.shape[1]
    hs = wproj_ref.shape[1]

    @pl.when(h == 0)
    def _init():
        acc_ref[...] = jnp.zeros_like(acc_ref)

    # bf16 operands, f32 accumulation on the MXU.
    x = x_ref[0].astype(jnp.bfloat16)                                    # (T, C)
    qkv = jnp.dot(x, wqkv_ref[0], preferred_element_type=jnp.float32)    # (T, 3*hs) f32

    # Fold 1/sqrt(hs) into q (scales T*hs elements, not T*T).
    scale = jnp.float32(1.0) / jnp.sqrt(jnp.float32(hs))
    q = (qkv[:, :hs] * scale).astype(jnp.bfloat16)                       # (T, hs)
    k = qkv[:, hs:2 * hs].astype(jnp.bfloat16)                           # (T, hs)
    v = qkv[:, 2 * hs:3 * hs].astype(jnp.bfloat16)                       # (T, hs)

    # Scores: contract the head dim (no explicit transpose).
    s = lax.dot_general(q, k, (((1,), (1,)), ((), ())),
                        preferred_element_type=jnp.float32)              # (T, T) f32

    # Static causal mask; diagonal kept, so no all -inf rows (NaN-safe).
    row = lax.broadcasted_iota(jnp.int32, (T, T), 0)
    col = lax.broadcasted_iota(jnp.int32, (T, T), 1)
    s = jnp.where(row >= col, s, -jnp.inf)

    # Numerically stable softmax, strictly in f32 (exact normalization).
    m = jnp.max(s, axis=-1, keepdims=True)
    p = jnp.exp(s - m)
    p = p / jnp.sum(p, axis=-1, keepdims=True)

    head_out = jnp.dot(p.astype(jnp.bfloat16), v,
                       preferred_element_type=jnp.float32)               # (T, hs) f32

    # Per-head contribution to the output projection (replaces concat + one
    # big proj matmul): acc += head_out @ W_proj[h*hs:(h+1)*hs, :].
    acc_ref[...] += jnp.dot(head_out.astype(jnp.bfloat16), wproj_ref[0],
                            preferred_element_type=jnp.float32)          # (T, C)

    @pl.when(h == n_heads - 1)
    def _finalize():
        # Lane-dense (last dim = 384 = 3*128) unmasked store.
        o_ref[0] = (acc_ref[...] + bproj_ref[...]).astype(o_ref.dtype)


def pack_mha_params(wq, wk, wv, w_proj, b_proj):
    """ONE-TIME parameter prep (do this at init / checkpoint-load time, not
    per forward call).  Pure reshapes/concats, no transposes.

    wq/wk/wv : (H, C, hs)  per-head projection weights (== torch weight.T)
    w_proj   : (C, C)      acting as cat @ w_proj (== torch weight.T)
    b_proj   : (C,)
    """
    H, C, hs = wq.shape
    # Per-head [Q | K | V] columns, stored bf16 -> half the HBM weight bytes.
    w_qkv_heads = jnp.concatenate([wq, wk, wv], axis=-1).astype(jnp.bfloat16)   # (H, C, 3*hs)
    # Per-head row-slab of the output projection.
    w_proj_heads = w_proj.reshape(H, hs, C).astype(jnp.bfloat16)                # (H, hs, C)
    b_proj_row = b_proj.reshape(1, C).astype(jnp.float32)                       # (1, C)
    return w_qkv_heads, w_proj_heads, b_proj_row


def multi_head_attention(x, w_qkv_heads, w_proj_heads, b_proj_row):
    """x: (B, T, C) f32; packed params from pack_mha_params. Returns (B, T, C) f32."""
    B, T, C = x.shape
    H, _, three_hs = w_qkv_heads.shape
    hs = w_proj_heads.shape[1]
    assert three_hs == 3 * hs and H * hs == C

    return pl.pallas_call(
        fused_mha_kernel,
        out_shape=jax.ShapeDtypeStruct((B, T, C), jnp.float32),
        grid_spec=pltpu.PrefetchScalarGridSpec(
            num_scalar_prefetch=0,
            grid=(B, H),                       # batch parallel, heads = reduction
            in_specs=[
                pl.BlockSpec((1, T, C), lambda b, h: (b, 0, 0)),        # x
                pl.BlockSpec((1, C, 3 * hs), lambda b, h: (h, 0, 0)),   # qkv weights (bf16)
                pl.BlockSpec((1, hs, C), lambda b, h: (h, 0, 0)),       # proj rows (bf16)
                pl.BlockSpec((1, C), lambda b, h: (0, 0)),              # proj bias
            ],
            out_specs=pl.BlockSpec((1, T, C), lambda b, h: (b, 0, 0)),
            scratch_shapes=[pltpu.VMEM((T, C), jnp.float32)],           # f32 accumulator
        ),
        compiler_params=pltpu.CompilerParams(
            dimension_semantics=("parallel", "arbitrary"),
        ),
    )(x, w_qkv_heads, w_proj_heads, b_proj_row)


def _reference(x, wq, wk, wv, w_proj, b_proj):
    """Pure-JAX f32 reference matching the PyTorch forward (dropout = identity)."""
    B, T, C = x.shape
    outs = []
    for h in range(wq.shape[0]):
        q = x @ wq[h]
        k = x @ wk[h]
        v = x @ wv[h]
        s = (q @ jnp.swapaxes(k, -2, -1)) * (k.shape[-1] ** -0.5)
        mask = jnp.tril(jnp.ones((T, T), dtype=bool))
        s = jnp.where(mask, s, -jnp.inf)
        p = jax.nn.softmax(s, axis=-1)
        outs.append(p @ v)
    cat = jnp.concatenate(outs, axis=-1)
    return cat @ w_proj + b_proj


if __name__ == "__main__":
    key = jax.random.PRNGKey(0)
    kx, kq, kk, kv, kw, kb = jax.random.split(key, 6)

    x = jax.random.normal(kx, (BATCH, SEQ, N_EMBD), dtype=jnp.float32)

    # Per-head QKV weights (no bias), proj with bias — stored as x @ w layout
    # (== torch Linear weight transposed).
    scale = 0.02
    wq = scale * jax.random.normal(kq, (NUM_HEADS, N_EMBD, HEAD_SIZE), jnp.float32)
    wk = scale * jax.random.normal(kk, (NUM_HEADS, N_EMBD, HEAD_SIZE), jnp.float32)
    wv = scale * jax.random.normal(kv, (NUM_HEADS, N_EMBD, HEAD_SIZE), jnp.float32)
    w_proj = scale * jax.random.normal(kw, (N_EMBD, N_EMBD), jnp.float32)
    b_proj = scale * jax.random.normal(kb, (N_EMBD,), jnp.float32)

    # One-time packing (hoisted out of the forward path).
    w_qkv_heads, w_proj_heads, b_proj_row = pack_mha_params(wq, wk, wv, w_proj, b_proj)

    out = multi_head_attention(x, w_qkv_heads, w_proj_heads, b_proj_row)
    out = jax.block_until_ready(out)

    ref = _reference(x, wq, wk, wv, w_proj, b_proj)
    assert out.shape == (BATCH, SEQ, N_EMBD), out.shape
    # Tolerance accounts for bf16 matmul operands (f32 accumulation/softmax);
    # measured error is ~1e-3, so 1e-2 has ample margin while staying meaningful.
    assert jnp.allclose(out, ref, atol=1e-2, rtol=1e-2), "mismatch vs reference"

    print("KERNEL_OK")
</pallas_src>

<mosaic_0001>
module attributes {stable_mosaic.version = 11 : i64} {
  func.func @fused_mha_kernel(%arg0: i32, %arg1: i32, %arg2: memref<1x16x384xf32, #tpu.memory_space<vmem>>, %arg3: memref<1x384x192xbf16, #tpu.memory_space<vmem>>, %arg4: memref<1x64x384xbf16, #tpu.memory_space<vmem>>, %arg5: memref<1x384xf32, #tpu.memory_space<vmem>>, %arg6: memref<1x16x384xf32, #tpu.memory_space<vmem>>, %arg7: memref<16x384xf32, #tpu.memory_space<vmem>>) attributes {dimension_semantics = [#tpu.dimension_semantics<parallel>, #tpu.dimension_semantics<arbitrary>], iteration_bounds = array<i64: 2, 6>, scalar_prefetch = 0 : i64, scratch_operands = 1 : i64, tpu.core_type = #tpu.core_type<tc>, window_params = [{transform_indices = @transform_0, window_bounds = array<i64: 1, 16, 384>}, {transform_indices = @transform_1, window_bounds = array<i64: 1, 384, 192>}, {transform_indices = @transform_2, window_bounds = array<i64: 1, 64, 384>}, {pipeline_mode = #tpu.pipeline_mode<synchronous>, transform_indices = @transform_3, window_bounds = array<i64: 1, 384>}, {transform_indices = @transform_4, window_bounds = array<i64: 1, 16, 384>}]} {
    %c0_i32 = arith.constant 0 : i32
    %0 = arith.cmpi eq, %arg1, %c0_i32 : i32
    %1 = arith.extui %0 : i1 to i32
    %c0_i32_0 = arith.constant 0 : i32
    %2 = arith.cmpi ne, %1, %c0_i32_0 : i32
    scf.if %2 {
      %cst_22 = arith.constant 0.000000e+00 : f32
      %46 = vector.broadcast %cst_22 : f32 to vector<16x384xf32>
      %c0_23 = arith.constant 0 : index
      %c0_24 = arith.constant 0 : index
      %47 = vector.load %arg7[%c0_23, %c0_24] : memref<16x384xf32, #tpu.memory_space<vmem>>, vector<16x384xf32>
      tpu.vector_store %arg7[%c0_23, %c0_24], %46 {strides = array<i32>} : memref<16x384xf32, #tpu.memory_space<vmem>>, vector<16x384xf32>,
    } else {
    }
    %c0 = arith.constant 0 : index
    %c0_1 = arith.constant 0 : index
    %c0_2 = arith.constant 0 : index
    %3 = vector.load %arg2[%c0, %c0_1, %c0_2] : memref<1x16x384xf32, #tpu.memory_space<vmem>>, vector<1x16x384xf32>
    %4 = vector.shape_cast %3 : vector<1x16x384xf32> to vector<16x384xf32>
    %5 = arith.truncf %4 : vector<16x384xf32> to vector<16x384xbf16>
    %c0_3 = arith.constant 0 : index
    %c0_4 = arith.constant 0 : index
    %c0_5 = arith.constant 0 : index
    %6 = vector.load %arg3[%c0_3, %c0_4, %c0_5] : memref<1x384x192xbf16, #tpu.memory_space<vmem>>, vector<1x384x192xbf16>
    %7 = vector.shape_cast %6 : vector<1x384x192xbf16> to vector<384x192xbf16>
    %cst = arith.constant dense<0.000000e+00> : vector<16x192xf32>
    %8 = tpu.matmul %5, %7, %cst {dimension_numbers = #tpu.dot_dimension_numbers<[1], [0], [0], [1], [0, 0, 1, 1], [], []>} : vector<16x384xbf16>, vector<384x192xbf16>, vector<16x192xf32> -> vector<16x192xf32>
    %cst_6 = arith.constant 6.400000e+01 : f32
    %9 = math.sqrt %cst_6 : f32
    %cst_7 = arith.constant 1.000000e+00 : f32
    %10 = arith.divf %cst_7, %9 : f32
    %11 = vector.extract_strided_slice %8 {offsets = [0, 0], sizes = [16, 64], strides = [1, 1]} : vector<16x192xf32> to vector<16x64xf32>
    %12 = vector.broadcast %10 : f32 to vector<16x64xf32>
    %13 = arith.mulf %11, %12 : vector<16x64xf32>
    %14 = arith.truncf %13 : vector<16x64xf32> to vector<16x64xbf16>
    %15 = vector.extract_strided_slice %8 {offsets = [0, 64], sizes = [16, 64], strides = [1, 1]} : vector<16x192xf32> to vector<16x64xf32>
    %16 = arith.truncf %15 : vector<16x64xf32> to vector<16x64xbf16>
    %17 = vector.extract_strided_slice %8 {offsets = [0, 128], sizes = [16, 64], strides = [1, 1]} : vector<16x192xf32> to vector<16x64xf32>
    %18 = arith.truncf %17 : vector<16x64xf32> to vector<16x64xbf16>
    %cst_8 = arith.constant dense<0.000000e+00> : vector<16x16xf32>
    %19 = tpu.matmul %14, %16, %cst_8 {dimension_numbers = #tpu.dot_dimension_numbers<[1], [1], [0], [0], [0, 0, 1, 0], [], []>} : vector<16x64xbf16>, vector<16x64xbf16>, vector<16x16xf32> -> vector<16x16xf32>
    %20 = tpu.iota {dimensions = array<i32: 0>} : vector<16x16xi32>
    %21 = tpu.iota {dimensions = array<i32: 1>} : vector<16x16xi32>
    %22 = arith.cmpi sge, %20, %21 : vector<16x16xi32>
    %cst_9 = arith.constant 0xFF800000 : f32
    %23 = vector.broadcast %cst_9 : f32 to vector<16x16xf32>
    %24 = arith.select %22, %19, %23 : vector<16x16xi1>, vector<16x16xf32>
    %cst_10 = arith.constant dense<0xFF800000> : vector<16xf32>
    %25 = vector.multi_reduction <maximumf>, %24, %cst_10 [1] : vector<16x16xf32> to vector<16xf32>
    %26 = vector.shape_cast %25 : vector<16xf32> to vector<16x1xf32>
    %27 = vector.broadcast %26 : vector<16x1xf32> to vector<16x16xf32>
    %28 = arith.subf %24, %27 : vector<16x16xf32>
    %29 = math.exp %28 : vector<16x16xf32>
    %cst_11 = arith.constant dense<0.000000e+00> : vector<16xf32>
    %30 = vector.multi_reduction <add>, %29, %cst_11 [1] : vector<16x16xf32> to vector<16xf32>
    %31 = vector.shape_cast %30 : vector<16xf32> to vector<16x1xf32>
    %32 = vector.broadcast %31 : vector<16x1xf32> to vector<16x16xf32>
    %33 = arith.divf %29, %32 : vector<16x16xf32>
    %34 = arith.truncf %33 : vector<16x16xf32> to vector<16x16xbf16>
    %cst_12 = arith.constant dense<0.000000e+00> : vector<16x64xf32>
    %35 = tpu.matmul %34, %18, %cst_12 {dimension_numbers = #tpu.dot_dimension_numbers<[1], [0], [0], [1], [0, 0, 1, 1], [], []>} : vector<16x16xbf16>, vector<16x64xbf16>, vector<16x64xf32> -> vector<16x64xf32>
    %c0_13 = arith.constant 0 : index
    %c0_14 = arith.constant 0 : index
    %36 = vector.load %arg7[%c0_13, %c0_14] : memref<16x384xf32, #tpu.memory_space<vmem>>, vector<16x384xf32>
    %37 = arith.truncf %35 : vector<16x64xf32> to vector<16x64xbf16>
    %c0_15 = arith.constant 0 : index
    %c0_16 = arith.constant 0 : index
    %c0_17 = arith.constant 0 : index
    %38 = vector.load %arg4[%c0_15, %c0_16, %c0_17] : memref<1x64x384xbf16, #tpu.memory_space<vmem>>, vector<1x64x384xbf16>
    %39 = vector.shape_cast %38 : vector<1x64x384xbf16> to vector<64x384xbf16>
    %cst_18 = arith.constant dense<0.000000e+00> : vector<16x384xf32>
    %40 = tpu.matmul %37, %39, %cst_18 {dimension_numbers = #tpu.dot_dimension_numbers<[1], [0], [0], [1], [0, 0, 1, 1], [], []>} : vector<16x64xbf16>, vector<64x384xbf16>, vector<16x384xf32> -> vector<16x384xf32>
    %41 = arith.addf %36, %40 : vector<16x384xf32>
    %c0_19 = arith.constant 0 : index
    %c0_20 = arith.constant 0 : index
    %42 = vector.load %arg7[%c0_19, %c0_20] : memref<16x384xf32, #tpu.memory_space<vmem>>, vector<16x384xf32>
    tpu.vector_store %arg7[%c0_19, %c0_20], %41 {strides = array<i32>} : memref<16x384xf32, #tpu.memory_space<vmem>>, vector<16x384xf32>,
    %c5_i32 = arith.constant 5 : i32
    %43 = arith.cmpi eq, %arg1, %c5_i32 : i32
    %44 = arith.extui %43 : i1 to i32
    %c0_i32_21 = arith.constant 0 : i32
    %45 = arith.cmpi ne, %44, %c0_i32_21 : i32
    scf.if %45 {
      %c0_22 = arith.constant 0 : index
      %c0_23 = arith.constant 0 : index
      %46 = vector.load %arg7[%c0_22, %c0_23] : memref<16x384xf32, #tpu.memory_space<vmem>>, vector<16x384xf32>
      %c0_24 = arith.constant 0 : index
      %c0_25 = arith.constant 0 : index
      %47 = vector.load %arg5[%c0_24, %c0_25] : memref<1x384xf32, #tpu.memory_space<vmem>>, vector<1x384xf32>
      %48 = vector.broadcast %47 : vector<1x384xf32> to vector<16x384xf32>
      %49 = arith.addf %46, %48 : vector<16x384xf32>
      %c0_26 = arith.constant 0 : index
      %c0_27 = arith.constant 0 : index
      %c0_28 = arith.constant 0 : index
      %50 = vector.load %arg6[%c0_26, %c0_27, %c0_28] : memref<1x16x384xf32, #tpu.memory_space<vmem>>, vector<1x16x384xf32>
      %51 = vector.shape_cast %50 : vector<1x16x384xf32> to vector<16x384xf32>
      %52 = vector.shape_cast %49 : vector<16x384xf32> to vector<1x16x384xf32>
      tpu.vector_store %arg6[%c0_26, %c0_27, %c0_28], %52 {strides = array<i32>} : memref<1x16x384xf32, #tpu.memory_space<vmem>>, vector<1x16x384xf32>,
    } else {
    }
    return
  }
  func.func @transform_0(%arg0: i32, %arg1: i32) -> (i32, i32, i32) {
    %c0_i32 = arith.constant 0 : i32
    %c0_i32_0 = arith.constant 0 : i32
    %c0_i32_1 = arith.constant 0 : i32
    return %arg0, %c0_i32, %c0_i32_0 : i32, i32, i32
  }
  func.func @transform_1(%arg0: i32, %arg1: i32) -> (i32, i32, i32) {
    %c0_i32 = arith.constant 0 : i32
    %c0_i32_0 = arith.constant 0 : i32
    %c0_i32_1 = arith.constant 0 : i32
    return %arg1, %c0_i32, %c0_i32_0 : i32, i32, i32
  }
  func.func @transform_2(%arg0: i32, %arg1: i32) -> (i32, i32, i32) {
    %c0_i32 = arith.constant 0 : i32
    %c0_i32_0 = arith.constant 0 : i32
    %c0_i32_1 = arith.constant 0 : i32
    return %arg1, %c0_i32, %c0_i32_0 : i32, i32, i32
  }
  func.func @transform_3(%arg0: i32, %arg1: i32) -> (i32, i32) {
    %c0_i32 = arith.constant 0 : i32
    %c0_i32_0 = arith.constant 0 : i32
    %c0_i32_1 = arith.constant 0 : i32
    return %c0_i32, %c0_i32_0 : i32, i32
  }
  func.func @transform_4(%arg0: i32, %arg1: i32) -> (i32, i32, i32) {
    %c0_i32 = arith.constant 0 : i32
    %c0_i32_0 = arith.constant 0 : i32
    %c0_i32_1 = arith.constant 0 : i32
    return %arg0, %c0_i32, %c0_i32_0 : i32, i32, i32
  }
}

</mosaic_0001>

<bundles_post_ra>
// kernel: tpu_custom_call.1
= control target key start
LH: loop header
LB: loop body
LE: loop exit
PB: predicated region body
PF: predicated region fallthrough
CT: control target
= control target key end

     0   :  { %9 = vsyncpa [#allocation4], 0  ;;  %s1789_s0 = inlined_call_operand.vmem [shape: f32[2,16,384], index: 0, kind: input, shape index: {}]   ;;  %s1790_s1 = inlined_call_operand.vmem [shape: bf16[6,384,192], index: 1, kind: input, shape index: {}]   ;;  %s1791_s2 = inlined_call_operand.vmem [shape: bf16[6,64,384], index: 2, kind: input, shape index: {}]   ;;  %s1792_s3 = inlined_call_operand.vmem [shape: f32[1,384], index: 3, kind: input, shape index: {}]   ;;  %s1793_s4 = inlined_call_operand.hbm [shape: f32[2,16,384], index: 4, kind: output, shape index: {}]  }
   0x1   :  { %11 = vsyncpa [#allocation4 + $0x1], 0  ;;  %s1527_s15 = smov 0   ;;  %s1529_s16 = smov 0  }
   0x2   :  { %s1531_s17 = smov 0   ;;  %s1533_s18 = smov 0  }
   0x3   :  { %s1535_s19 = smov 0   ;;  %s1537_s20 = smov 0  }
   0x4   :  { %s1539_s21 = smov 0   ;;  %s1541_s22 = smov 0  }
   0x5 LB: > { %1797 = sst [smem:[#allocation6_spill]] %s1488_s21  ;;  %s1111_s23 = sadd.s32 4294967295, %s1492_s22   ;;  %s1492_s22 = sphi %s1541_s22, %s17_s22   ;;  %s1488_s21 = sphi %s1539_s21, %s1805_s21   ;;  %s1484_s20 = sphi %s1537_s20, %s1810_s20   ;;  %s1480_s19 = sphi %s1535_s19, %s1803_s19   ;;  %s1476_s18 = sphi %s1533_s18, %s1809_s18   ;;  %s1472_s17 = sphi %s1531_s17, %s1808_s17   ;;  %s1468_s16 = sphi %s1529_s16, %s1807_s16   ;;  %s1464_s15 = sphi %s1527_s15, %s1806_s15  }
   0x6   : > { %s1112_s24 = sadd.s32 4294967294, %s1492_s22   ;;  %s26_s25 = sadd.s32 1, %s1484_s20 }
   0x7   : > { %p27_p0 = scmp.ge.s32.totalorder %s26_s25, 6  ;;  %s29_s26 = sadd.s32 1, %s1488_s21 }
   0x8   : > { %p145_p1 = scmp.ne.s32.totalorder %s1472_s17, %s1468_s16  ;;  %p146_p2 = scmp.eq.s32.totalorder %s1111_s23, 11 }
   0x9   : > { %s1812_s25 = smov (%p27_p0, %s26_s25), 0  ;;  %s1814_s26 = smov (!%p27_p0, %s29_s26), %s1488_s21 }
   0xa   : > { %1798 = sst [smem:[#allocation7_spill]] %s1812_s25  ;;  %p1576_p3 = por %p146_p2, %p145_p1 }
   0xb   : > { %p151_p4 = scmp.ne.s32.totalorder %s1468_s16, %s1464_s15  ;;  %p31_p5 = scmp.ge.s32.totalorder %s1814_s26, 2 }
   0xc   : > { %p152_p6 = scmp.eq.s32.totalorder %s1112_s24, 11  ;;  %p1115_p7 = scmp.ge.s32.totalorder %s1492_s22, 1 }
   0xd   : > { %p197_p8 = scmp.lt.s32.totalorder %s1492_s22, 13  ;;  %s1816_s26 = smov (%p31_p5, %s1814_s26), 0 }
   0xe   : > { %1800 = sst [smem:[#allocation8_spill]] %s1816_s26  ;;  %p1586_p9 = por %p152_p6, %p151_p4 }
   0xf   : > { %p198_p10 = pnand %p1115_p7, %p197_p8  ;;  %s132_s29 = ssub.s32 %s1488_s21, %s1816_s26 }
  0x10   : > { %s135_s30 = sadd.s32 1, %s1472_s17  ;;  %p133_p11 = scmp.eq.s32.totalorder %s132_s29, 0 }
  0x11   : > { %201 = sbr.rel (%p198_p10) target bundleno = 1373 (0x55d), region = 36  ;;  %s1795_s6 = sand.u32 (!%p198_p10), 1, %s1468_s16  }
  0x12   : > { %s1594_s5 = scalar_select %p133_p11, %s1472_s17, %s135_s30  }
  0x13   : > { %p233_p12 = scmp.lt.s32.totalorder (!%p198_p10), %s1480_s19, 1  ;;  %s1221_s7 = smul.u32 (!%p198_p10), 48, %s1795_s6 }
  0x14   : > { %p238_p13 = scmp.lt.s32.totalorder (!%p198_p10), %s1476_s18, 5  ;;  %p1119_p0 = scmp.ne.s32.totalorder (!%p198_p10), %s1476_s18, 0 }
  0x15   : > { %s1618_s21 = scalar_lea.vmem (!%p198_p10), [#allocation3], %s1221_s7 }
  0x16   : > { %s234_s8 = scalar_select %p233_p12, %s1480_s19, 1 }
  0x17   : > { %s239_s10 = scalar_select %p238_p13, %s1476_s18, 5 }
  0x18   : > { %s1222_s9 = smul.u32 48, %s234_s8 }
  0x19   : > { %s1223_s14 = smul.u32 384, %s239_s10 }
  0x1a   : > { %s1606_s13 = scalar_lea.vmem %s1789_s0, %s1222_s9  ;;  %s1224_s23 = smul.u32 96, %s239_s10 }
  0x1b   : > { %s1611_s30 = scalar_lea.vmem %s1790_s1, %s1223_s14  ;;  %252 = sbr.rel (%p1119_p0) target bundleno = 36 (0x24), region = 40 }
  0x1c   : > { %s1616_s6 = scalar_lea.vmem %s1791_s2, %s1224_s23 }
  0x20   : > { %v1494_v0 = vmov 0.0  }
  0x21   : > { %253 = vst [vmem:[#allocation2 + $0x28] sm:$0xff] %v1494_v0  ;;  %254 = vst [vmem:[#allocation2 + $0x10] sm:$0xff] %v1494_v0 }
  0x22   : > { %255 = vst [vmem:[#allocation2 + $0x8] sm:$0xff] %v1494_v0  ;;  %256 = vst [vmem:[#allocation2] sm:$0xff] %v1494_v0 }
  0x23   : > { %257 = vst [vmem:[#allocation2 + $0x18] sm:$0xff] %v1494_v0  ;;  %258 = vst [vmem:[#allocation2 + $0x20] sm:$0xff] %v1494_v0 }
  0x24 PF: > { %v1304_v1 = vld [vmem:[%s1611_s30 + $0x74] ss:$8 sps:$4 sm:$0xff]   ;;  %v1306_v2 = vld [vmem:[%s1611_s30 + $0x70] ss:$8 sps:$4 sm:$0xff]   ;;  %v1495_v3 = vmov 0   ;;  %v260_v34 = vld [vmem:[%s1606_s13 + $0x8] sm:$0xff] }
  0x25   : > { %631 = vmatprep.mubr.bf16.mxu1 %v1495_v3  ;;  %556 = vmatprep.subr.bf16.mxu0 %v1304_v1  ;;  %v1307_v4 = vld [vmem:[%s1611_s30 + $0x64] ss:$8 sps:$4 sm:$0xff]   ;;  %v1309_v5 = vld [vmem:[%s1611_s30 + $0x60] ss:$8 sps:$4 sm:$0xff]   ;;  %v1310_v6 = vld [vmem:[%s1611_s30 + $0x54] ss:$8 sps:$4 sm:$0xff]  }
  0x26   : > { %557 = vmatpush1.bf16.msra.mxu0 %v1306_v2  ;;  %v1312_v7 = vld [vmem:[%s1611_s30 + $0x50] ss:$8 sps:$4 sm:$0xff]   ;;  %v1313_v8 = vld [vmem:[%s1611_s30 + $0x44] ss:$8 sps:$4 sm:$0xff]   ;;  %v1325_v9 = vld [vmem:[%s1611_s30 + $0x174] ss:$8 sps:$4 sm:$0xff]  }
  0x27   : > { %558 = vmatprep.subr.bf16.mxu0 %v1307_v4  ;;  %v1327_v10 = vld [vmem:[%s1611_s30 + $0x170] ss:$8 sps:$4 sm:$0xff]   ;;  %v1315_v11 = vld [vmem:[%s1611_s30 + $0x40] ss:$8 sps:$4 sm:$0xff]   ;;  %v1316_v12 = vld [vmem:[%s1611_s30 + $0x34] ss:$8 sps:$4 sm:$0xff]   ;;  %599 = vmatprep.subr.bf16.mxu1 %v1325_v9 }
  0x28   : > { %v1331_v13 = vld [vmem:[%s1611_s30 + $0x164] ss:$8 sps:$4 sm:$0xff]   ;;  %600 = vmatpush1.bf16.msra.mxu1 %v1327_v10  ;;  %v1333_v14 = vld [vmem:[%s1611_s30 + $0x160] ss:$8 sps:$4 sm:$0xff]   ;;  %v1318_v15 = vld [vmem:[%s1611_s30 + $0x30] ss:$8 sps:$4 sm:$0xff]  }
  0x29   : > { %601 = vmatprep.subr.bf16.mxu1 %v1331_v13  ;;  %v1337_v16 = vld [vmem:[%s1611_s30 + $0x154] ss:$8 sps:$4 sm:$0xff]   ;;  %v1319_v17 = vld [vmem:[%s1611_s30 + $0x24] ss:$8 sps:$4 sm:$0xff]   ;;  %v1339_v18 = vld [vmem:[%s1611_s30 + $0x150] ss:$8 sps:$4 sm:$0xff]  }
  0x2a   : > { %559 = vmatpush1.bf16.msra.mxu0 %v1309_v5  ;;  %v1343_v19 = vld [vmem:[%s1611_s30 + $0x144] ss:$8 sps:$4 sm:$0xff]   ;;  %v1321_v20 = vld [vmem:[%s1611_s30 + $0x20] ss:$8 sps:$4 sm:$0xff]   ;;  %v1322_v21 = vld [vmem:[%s1611_s30 + $0x14] ss:$8 sps:$4 sm:$0xff]  }
  0x2b   : > { %560 = vmatprep.subr.bf16.mxu0 %v1310_v6  ;;  %v1345_v22 = vld [vmem:[%s1611_s30 + $0x140] ss:$8 sps:$4 sm:$0xff]   ;;  %v1349_v23 = vld [vmem:[%s1611_s30 + $0x134] ss:$8 sps:$4 sm:$0xff]   ;;  %v1324_v24 = vld [vmem:[%s1611_s30 + $0x10] ss:$8 sps:$4 sm:$0xff]  }
  0x2c   : > { %602 = vmatpush1.bf16.msra.mxu1 %v1333_v14  ;;  %v1328_v25 = vld [vmem:[%s1611_s30 + $0x4] ss:$8 sps:$4 sm:$0xff]   ;;  %v1351_v26 = vld [vmem:[%s1611_s30 + $0x130] ss:$8 sps:$4 sm:$0xff]   ;;  %v1330_v28 = vld [vmem:[%s1611_s30] ss:$8 sps:$4 sm:$0xff]  }
  0x2d   : > { %603 = vmatprep.subr.bf16.mxu1 %v1337_v16  ;;  %v1355_v27 = vld [vmem:[%s1611_s30 + $0x124] ss:$8 sps:$4 sm:$0xff]   ;;  %v1334_v29 = vld [vmem:[%s1611_s30 + $0xf4] ss:$8 sps:$4 sm:$0xff]   ;;  %v1357_v30 = vld [vmem:[%s1611_s30 + $0x120] ss:$8 sps:$4 sm:$0xff]   ;;  %v698_v16 = vlaneseq }
  0x2e   : > { %561 = vmatpush1.bf16.msra.mxu0 %v1312_v7  ;;  %v1361_v31 = vld [vmem:[%s1611_s30 + $0x114] ss:$8 sps:$4 sm:$0xff]   ;;  %v1336_v32 = vld [vmem:[%s1611_s30 + $0xf0] ss:$8 sps:$4 sm:$0xff]   ;;  %v1340_v33 = vld [vmem:[%s1611_s30 + $0xe4] ss:$8 sps:$4 sm:$0xff]  }
  0x2f   : > { %562 = vmatprep.subr.bf16.mxu0 %v1313_v8  ;;  %v1342_v35 = vld [vmem:[%s1611_s30 + $0xe0] ss:$8 sps:$4 sm:$0xff]   ;;  %v1363_v36 = vld [vmem:[%s1611_s30 + $0x110] ss:$8 sps:$4 sm:$0xff]   ;;  %v1367_v37 = vld [vmem:[%s1611_s30 + $0x104] ss:$8 sps:$4 sm:$0xff]  }
  0x30   : > { %604 = vmatpush1.bf16.msra.mxu1 %v1339_v18  ;;  %v263_v38 = vld [vmem:[%s1606_s13 + $0x20] sm:$0xff]  ;;  %v1346_v39 = vld [vmem:[%s1611_s30 + $0xd4] ss:$8 sps:$4 sm:$0xff]   ;;  %v264_v43 = vld [vmem:[%s1606_s13 + $0x28] sm:$0xff]  ;;  %v1496_v60 = vmov 0.0   ;;  %vm1497_vm0 = vmmov 0  }
  0x31   : > { %605 = vmatprep.subr.bf16.mxu1 %v1343_v19  ;;  %v266_v40 = vpack.c.bf16 %v263_v38, %v260_v34  ;;  %v1369_v41 = vld [vmem:[%s1611_s30 + $0x100] ss:$8 sps:$4 sm:$0xff]   ;;  %v261_v42 = vld [vmem:[%s1606_s13 + $0x10] sm:$0xff]  ;;  %v1352_v45 = vld [vmem:[%s1611_s30 + $0xc4] ss:$8 sps:$4 sm:$0xff]   ;;  %s1498_s25 = smov 64  }
  0x32   : > { %563 = vmatpush1.bf16.msra.mxu0 %v1315_v11  ;;  %v1348_v44 = vld [vmem:[%s1611_s30 + $0xd0] ss:$8 sps:$4 sm:$0xff]   ;;  %v267_v46 = vpack.c.bf16 %v264_v43, %v261_v42  ;;  %v1354_v47 = vld [vmem:[%s1611_s30 + $0xc0] ss:$8 sps:$4 sm:$0xff]   ;;  %v1358_v48 = vld [vmem:[%s1611_s30 + $0xb4] ss:$8 sps:$4 sm:$0xff]  }
  0x33   : > { %564 = vmatprep.subr.bf16.mxu0 %v1316_v12  ;;  %588 = vmatprep.mubr.bf16.mxu0 %v266_v40  ;;  %v1360_v49 = vld [vmem:[%s1611_s30 + $0xb0] ss:$8 sps:$4 sm:$0xff]   ;;  %v1364_v50 = vld [vmem:[%s1611_s30 + $0xa4] ss:$8 sps:$4 sm:$0xff]   ;;  %v1366_v51 = vld [vmem:[%s1611_s30 + $0xa0] ss:$8 sps:$4 sm:$0xff]  }
  0x34   : > { %606 = vmatpush1.bf16.msra.mxu1 %v1345_v22  ;;  %v1370_v52 = vld [vmem:[%s1611_s30 + $0x94] ss:$8 sps:$4 sm:$0xff]   ;;  %v1372_v53 = vld [vmem:[%s1611_s30 + $0x90] ss:$8 sps:$4 sm:$0xff]   ;;  %v1373_v54 = vld [vmem:[%s1611_s30 + $0x84] ss:$8 sps:$4 sm:$0xff]  }
  0x35   : > { %607 = vmatprep.subr.bf16.mxu1 %v1349_v23  ;;  %v1375_v55 = vld [vmem:[%s1611_s30 + $0x80] ss:$8 sps:$4 sm:$0xff]   ;;  %v262_v57 = vld [vmem:[%s1606_s13 + $0x18] sm:$0xff]  ;;  %vm650_vm1 = vcmask 523264   ;;  %v702_v18 = vand.u32 127, %v698_v16  ;;  %vm707_vm3 = vcmask 130048  }
  0x36   : > { %565 = vmatpush1.bf16.msra.mxu0 %v1318_v15  ;;  %v259_v56 = vld [vmem:[%s1606_s13] sm:$0xff]  ;;  %v1378_v38 = vld [vmem:[%s1616_s6 + $0x4c] ss:$12 sps:$4 sm:$0xff]   ;;  %p1184_p1 = scmp.ne.s32.totalorder %s1476_s18, 5 }
  0x37   : > { %566 = vmatprep.subr.bf16.mxu0 %v1319_v17  ;;  %v265_v58 = vpack.c.bf16 %v262_v57, %v259_v56  ;;  %v1687_v17 = vshrl.u32 %v698_v16, 7  ;;  %v1383_v40 = vld [vmem:[%s1616_s6 + $0x38] ss:$12 sps:$4 sm:$0xff]   ;;  %v1391_v56 = vld [vmem:[%s1616_s6 + $0x8] ss:$12 sps:$4 sm:$0xff]  }
  0x38   : > { %608 = vmatpush1.bf16.msra.mxu1 %v1351_v26 }
  0x39   : > { %609 = vmatprep.subr.bf16.mxu1 %v1355_v27  ;;  %vm703_vm2 = vcmp.ge.s32.totalorder %v1687_v17, %v702_v18  ;;  %v700_v19 = vadd.s32 8, %v1687_v17 }
  0x3a   : > { %567 = vmatpush1.bf16.msra.mxu0 %v1321_v20 }
  0x3b   : > { %568 = vmatprep.subr.bf16.mxu0 %v1322_v21  ;;  %vm704_vm4 = vcmp.ge.s32.totalorder %v700_v19, %v702_v18 }
  0x3c   : > { %610 = vmatpush1.bf16.msra.mxu1 %v1357_v30 }
  0x3d   : > { %611 = vmatprep.subr.bf16.mxu1 %v1361_v31 }
  0x3e   : > { %569 = vmatpush1.bf16.msra.mxu0 %v1324_v24 }
  0x3f   : > { %570 = vmatprep.subr.bf16.mxu0 %v1328_v25 }
  0x40   : > { %612 = vmatpush1.bf16.msra.mxu1 %v1363_v36 }
  0x41   : > { %613 = vmatprep.subr.bf16.mxu1 %v1367_v37 }
  0x42   : > { %571 = vmatpush1.bf16.msra.mxu0 %v1330_v28 }
  0x43   : > { %572 = vmatprep.subr.bf16.mxu0 %v1334_v29 }
  0x44   : > { %614 = vmatpush1.bf16.msra.mxu1 %v1369_v41 }
  0x45   : > { %1197 = vmatprep.subr.bf16.mxu1 %v1496_v60 }
  0x46   : > { %573 = vmatpush2.bf16.msra.mxu0 %v1336_v32 }
  0x47   : > { %574 = vmatprep.subr.bf16.mxu0 %v1340_v33  ;;  %632 = vmatmul.mubr.bf16.vlgmr.msra.gmra.mxu1 %v267_v46 }
  0x48   : > { %1199 = vmatprep.mubr.msk.bf16.mxu1 %vm1497_vm0, %v1496_v60 }
  0x4a   : > { %575 = vmatpush2.bf16.msra.mxu0 %v1342_v35 }
  0x4b   : > { %576 = vmatprep.subr.bf16.mxu0 %v1346_v39  ;;  %v1379_v39 = vld [vmem:[%s1616_s6 + $0x50] ss:$12 sps:$4 sm:$0xff]  }
  0x4e   : > { %577 = vmatpush2.bf16.msra.mxu0 %v1348_v44 }
  0x4f   : > { %578 = vmatprep.subr.bf16.mxu0 %v1352_v45 }
  0x52   : > { %579 = vmatpush2.bf16.msra.mxu0 %v1354_v47  ;;  %v1376_v47 = vld [vmem:[%s1616_s6 + $0x48] ss:$12 sps:$4 sm:$0xff]  }
  0x53   : > { %580 = vmatprep.subr.bf16.mxu0 %v1358_v48 }
  0x56   : > { %581 = vmatpush2.bf16.msra.mxu0 %v1360_v49  ;;  %v1382_v49 = vld [vmem:[%s1616_s6 + $0x34] ss:$12 sps:$4 sm:$0xff]  }
  0x57   : > { %582 = vmatprep.subr.bf16.mxu0 %v1364_v50  ;;  %v1380_v50 = vld [vmem:[%s1616_s6 + $0x30] ss:$12 sps:$4 sm:$0xff]  }
  0x5a   : > { %583 = vmatpush2.bf16.msra.mxu0 %v1366_v51  ;;  %v1386_v51 = vld [vmem:[%s1616_s6 + $0x1c] ss:$12 sps:$4 sm:$0xff]  }
  0x5b   : > { %584 = vmatprep.subr.bf16.mxu0 %v1370_v52  ;;  %v1384_v52 = vld [vmem:[%s1616_s6 + $0x18] ss:$12 sps:$4 sm:$0xff]  }
  0x5e   : > { %585 = vmatpush2.bf16.msra.mxu0 %v1372_v53  ;;  %v1387_v53 = vld [vmem:[%s1616_s6 + $0x20] ss:$12 sps:$4 sm:$0xff]  }
  0x5f   : > { %586 = vmatprep.subr.bf16.mxu0 %v1373_v54  ;;  %v1390_v54 = vld [vmem:[%s1616_s6 + $0x4] ss:$12 sps:$4 sm:$0xff]  }
  0x62   : > { %587 = vmatpush2.bf16.msra.mxu0 %v1375_v55  ;;  %v1388_v55 = vld [vmem:[%s1616_s6] ss:$12 sps:$4 sm:$0xff]  }
  0x63   : > { %1209 = vmatprep.subr.bf16.mxu0 %v1496_v60 }
  0x65   : > { %589 = vmatmul.mubr.bf16.vlgmr.msra.gmra.mxu0 %v265_v58 }
  0x66   : > { %1217 = vmatprep.mubr.msk.bf16.mxu0 %vm1497_vm0, %v1496_v60  ;;  %1210 = vmatpush3.bf16.msra.mxu0 %v1379_v39 }
  0x67   : > { %1211 = vmatprep.subr.bf16.mxu0 %v1496_v60 }
  0x6a   : > { %1212 = vmatpush3.bf16.msra.mxu0 %v1383_v40 }
  0x6b   : > { %1213 = vmatprep.subr.bf16.mxu0 %v1496_v60 }
  0x6e   : > { %1214 = vmatpush3.bf16.msra.mxu0 %v1387_v53 }
  0x6f   : > { %1215 = vmatprep.subr.bf16.mxu0 %v1496_v60 }
  0x72   : > { %1216 = vmatpush3.bf16.msra.mxu0 %v1391_v56 }
 0x107   : > { %v633_v59 = vpop.f32.mrf.mxu1 }
 0x109   : > { %v635_v61 = vpop.f32.mrf.mxu1 }
 0x10b   : > { %v637_v2 = vpop.f32.mrf.mxu1 }
 0x10d   : > { %v639_v13 = vpop.f32.mrf.mxu1 }
 0x125   : > { %v590_v62 = vpop.f32.mrf.mxu0 }
 0x126   : > { %v634_v0 = vadd.f32 %v633_v59, %v590_v62  ;;  %v775_v62 = vld [vmem:[#allocation2 + $0x28] sm:$0xff] }
 0x127   : > { %v592_v63 = vpop.f32.mrf.mxu0 }
 0x128   : > { %v636_v1 = vadd.f32 %v635_v61, %v592_v63  ;;  %v642_v6 = vmul.f32 0.125, %v634_v0  ;;  %v777_v63 = vld [vmem:[#allocation2 + $0x8] sm:$0xff] }
 0x129   : > { %v594_v4 = vpop.f32.mrf.mxu0 }
 0x12a   : > { %v638_v5 = vadd.f32 %v637_v2, %v594_v4  ;;  %v776_v2 = vld [vmem:[#allocation2 + $0x10] sm:$0xff] }
 0x12b   : > { %v596_v11 = vpop.f32.mrf.mxu0 }
 0x12c   : > { %v643_v7 = vmul.f32 0.125, %v638_v5  ;;  %v645_v8 = vpack.c.bf16 %v638_v5, %v634_v0  ;;  %v640_v14 = vadd.f32 %v639_v13, %v596_v11 }
 0x12e   : > { %v644_v9 = vpack.c.bf16 %v643_v7, %v642_v6  ;;  %648 = vrot.lane.b32.xlu0 %v645_v8, %s1498_s25  ;;  %v646_v15 = vpack.c.bf16 %v640_v14, %v636_v1  ;;  %v778_v7 = vld [vmem:[#allocation2] sm:$0xff] }
 0x12f   : > { %v780_v8 = vld [vmem:[#allocation2 + $0x20] sm:$0xff] }
 0x1a0   : > { %v649_v10 = vpop.permute.xlu0 %648 }
 0x1a1   : > { %v655_v12 = vsel %vm650_vm1, %v649_v10, 0 }
 0x1a2   : > { %1198 = vmatpush3.bf16.xpose.msra.mxu1 %v655_v12  ;;  %v779_v12 = vld [vmem:[#allocation2 + $0x18] sm:$0xff] }
 0x1a3   : > { %1203 = vmatprep.subr.bf16.mxu1 %v1496_v60 }
 0x1a9   : > { %1200 = vmatmul.mubr.msk.bf16.vlgmr.msra.gmra.mxu1 %vm650_vm1, %v644_v9 }
 0x1aa   : > { %1204 = vmatpush3.bf16.msra.mxu1 %v646_v15  ;;  %1205 = vmatprep.mubr.msk.bf16.mxu1 %vm1497_vm0, %v1496_v60 }
 0x1ab   : > { %873 = vmatprep.subr.bf16.mxu1 %v1378_v38 }
 0x269   : > { %v691_v20 = vpop.f32.mrf.mxu1 }
 0x26a   : > { %v705_v21 = vsel %vm703_vm2, %v691_v20, -inf }
 0x26b   : > { %v1201_v22 = vpop.f32.mrf.mxu1  ;;  %v708_v23 = vsel %vm707_vm3, %v705_v21, -inf }
 0x26c   : > { %709 = vmax.xlane.f32.xlu0 %v708_v23 }
 0x26d   : > { %v694_v24 = vpop.f32.mrf.mxu1 }
 0x26e   : > { %v706_v25 = vsel %vm704_vm4, %v694_v24, -inf }
 0x26f   : > { %v1202_v26 = vpop.f32.mrf.mxu1  ;;  %v711_v27 = vsel %vm707_vm3, %v706_v25, -inf }
 0x270   : > { %712 = vmax.xlane.f32.xlu1 %v711_v27 }
 0x2f5   : > { %v710_v28 = vpop.xlane.xlu0 %709 }
 0x2f6   : > { %v714_v29 = vsub.f32 %v705_v21, %v710_v28 }
 0x2f8   : > { %v716_v30 = vmul.f32 1.442695, %v714_v29 }
 0x2f9   : > { %v713_v31 = vpop.xlane.xlu1 %712 }
 0x2fa   : > { %1392 = vpow2.f32 %v716_v30  ;;  %v715_v32 = vsub.f32 %v706_v25, %v713_v31 }
 0x2fc   : > { %v718_v33 = vmul.f32 1.442695, %v715_v32 }
 0x2fe   : > { %1394 = vpow2.f32 %v718_v33 }
 0x307   : > { %v1393_v34 = vpop.eup %1392 }
 0x308   : > { %v720_v35 = vsel %vm707_vm3, %v1393_v34, 0.0 }
 0x309   : > { %721 = vadd.xlane.f32.xlu1 %v720_v35 }
 0x30b   : > { %v1395_v36 = vpop.eup %1394 }
 0x30c   : > { %v723_v37 = vsel %vm707_vm3, %v1395_v36, 0.0 }
 0x30d   : > { %724 = vadd.xlane.f32.xlu1 %v723_v37 }
 0x392   : > { %v722_v41 = vpop.xlane.xlu1 %721 }
 0x393   : > { %1396 = vrcp.f32 %v722_v41 }
 0x396   : > { %v725_v42 = vpop.xlane.xlu1 %724 }
 0x397   : > { %1398 = vrcp.f32 %v725_v42 }
 0x3a0   : > { %v1397_v43 = vpop.eup %1396 }
 0x3a1   : > { %v727_v46 = vmul.f32 %v1397_v43, %v1393_v34 }
 0x3a4   : > { %v1399_v44 = vpop.eup %1398 }
 0x3a5   : > { %v729_v45 = vmul.f32 %v1399_v44, %v1395_v36 }
 0x3a7   : > { %v730_v48 = vpack.c.bf16 %v729_v45, %v727_v46 }
 0x3a9   : > { %1206 = vmatmul.mubr.msk.bf16.vlgmr.msra.gmra.mxu1 %vm707_vm3, %v730_v48 }
 0x3aa   : > { %874 = vmatpush1.bf16.msra.mxu1 %v1376_v47  ;;  %897 = vmatprep.mubr.bf16.mxu1 %v1495_v3 }
 0x3ab   : > { %875 = vmatprep.subr.bf16.mxu1 %v1382_v49 }
 0x3ae   : > { %876 = vmatpush1.bf16.msra.mxu1 %v1380_v50 }
 0x3af   : > { %877 = vmatprep.subr.bf16.mxu1 %v1386_v51 }
 0x3b2   : > { %878 = vmatpush1.bf16.msra.mxu1 %v1384_v52 }
 0x3b3   : > { %879 = vmatprep.subr.bf16.mxu1 %v1390_v54 }
 0x3b6   : > { %880 = vmatpush1.bf16.msra.mxu1 %v1388_v55 }
 0x469   : > { %v768_v57 = vpop.f32.mrf.mxu1 }
 0x46b   : > { %v1207_v58 = vpop.f32.mrf.mxu1 }
 0x46d   : > { %v771_v59 = vpop.f32.mrf.mxu1 }
 0x46e   : > { %v781_v3 = vpack.c.bf16 %v771_v59, %v768_v57 }
 0x46f   : > { %v1208_v61 = vpop.f32.mrf.mxu1 }
 0x470   : > { %1182 = vmatmul.mubr.msk.bf16.vlgmr.msra.gmra.mxu1 %vm650_vm1, %v781_v3  ;;  %1218 = vmatmul.mubr.msk.bf16.vlgmr.msra.gmra.mxu0 %vm650_vm1, %v781_v3 }
 0x530   : > { %v899_v0 = vpop.f32.mrf.mxu1  ;;  %v942_v1 = vpop.f32.mrf.mxu0 }
 0x531   : > { %v949_v60 = vadd.f32 %v899_v0, %v775_v62  ;;  %v951_v4 = vadd.f32 %v942_v1, %v777_v63 }
 0x532   : > { %v901_v5 = vpop.f32.mrf.mxu1  ;;  %v1219_v6 = vpop.f32.mrf.mxu0 }
 0x533   : > { %955 = vst [vmem:[#allocation2 + $0x28] sm:$0xff] %v949_v60  ;;  %957 = vst [vmem:[#allocation2 + $0x8] sm:$0xff] %v951_v4  ;;  %v950_v9 = vadd.f32 %v901_v5, %v776_v2 }
 0x534   : > { %v903_v10 = vpop.f32.mrf.mxu1  ;;  %v945_v11 = vpop.f32.mrf.mxu0 }
 0x535   : > { %956 = vst [vmem:[#allocation2 + $0x10] sm:$0xff] %v950_v9  ;;  %v952_v13 = vadd.f32 %v903_v10, %v778_v7  ;;  %v954_v14 = vadd.f32 %v945_v11, %v780_v8  ;;  %964 = sbr.rel (%p1184_p1) target bundleno = 1348 (0x544), region = 44 }
 0x536   : > { %v905_v15 = vpop.f32.mrf.mxu1  ;;  %v1220_v16 = vpop.f32.mrf.mxu0 }
 0x537   : > { %958 = vst [vmem:[#allocation2] sm:$0xff] %v952_v13  ;;  %960 = vst [vmem:[#allocation2 + $0x20] sm:$0xff] %v954_v14  ;;  %v953_v18 = vadd.f32 %v905_v15, %v779_v12 }
 0x539   : > { %959 = vst [vmem:[#allocation2 + $0x18] sm:$0xff] %v953_v18 }
 0x53a   : > { %v965_v19 = vld [vmem:[#allocation2 + $0x28] sm:$0xff]  ;;  %v971_v20 = vld [vmem:[%s1792_s3] sm:$0x7]  ;;  %v975_v21 = vsub.s32 0, %v1687_v17  ;;  %v979_v22 = vsub.s32 1, %v1687_v17  ;;  %v983_v24 = vsub.s32 2, %v1687_v17 }
 0x53b   : > { %v967_v29 = vld [vmem:[#allocation2 + $0x8] sm:$0xff] }
 0x53c   : > { %v966_v23 = vld [vmem:[#allocation2 + $0x10] sm:$0xff]  ;;  %v976_v27 = vrot.slane %v971_v20, %v975_v21  ;;  %v980_v28 = vrot.slane %v971_v20, %v979_v22  ;;  %v984_v31 = vrot.slane %v971_v20, %v983_v24 }
 0x53e   : > { %v968_v25 = vld [vmem:[#allocation2] sm:$0xff]  ;;  %v988_v32 = vadd.f32 %v976_v27, %v965_v19  ;;  %v989_v33 = vadd.f32 %v980_v28, %v966_v23  ;;  %v990_v36 = vadd.f32 %v984_v31, %v967_v29 }
 0x53f   : > { %v970_v30 = vld [vmem:[#allocation2 + $0x20] sm:$0xff]  ;;  %v991_v34 = vadd.f32 %v976_v27, %v968_v25 }
 0x540   : > { %v969_v26 = vld [vmem:[#allocation2 + $0x18] sm:$0xff]  ;;  %v993_v37 = vadd.f32 %v984_v31, %v970_v30  ;;  %994 = vst [vmem:[%s1618_s21] sm:$0xff] %v988_v32  ;;  %995 = vst [vmem:[%s1618_s21 + $0x8] sm:$0xff] %v989_v33 }
 0x541   : > { %v992_v35 = vadd.f32 %v980_v28, %v969_v26  ;;  %997 = vst [vmem:[%s1618_s21 + $0x18] sm:$0xff] %v991_v34  ;;  %996 = vst [vmem:[%s1618_s21 + $0x10] sm:$0xff] %v990_v36 }
 0x542   : > { %999 = vst [vmem:[%s1618_s21 + $0x28] sm:$0xff] %v993_v37 }
 0x543   : > { %998 = vst [vmem:[%s1618_s21 + $0x20] sm:$0xff] %v992_v35 }
 0x544 PF: > { %s1225_s18 = smul.u32 768, %s1480_s19  ;;  %s1014_s7 = sshll.u32 %s1618_s21, 4  ;;  %s1734_s7 = int_to_ptr.vmem [resolvable:$true] %s1014_s7 }
 0x545   : > { %s1802_s11 = sand.u32 1, %s1468_s16   ;;  %s1400_s13 = scalar_lea.vmem %s1734_s7, 768 }
 0x546   : > { %s1732_s10 = scalar_lea.hbm %s1793_s4, %s1225_s18  ;;  %s1738_s12 = scalar_lea.sflag [#allocation4], %s1802_s11 }
 0x547   : > { %p1401_p2 = scmp.ne.s32.totalorder %s1734_s7, %s1400_s13  ;;  %s1499_s19 = smov [#allocation3]  }
 0x548   : > { %s1404_s21 = sshll.u32 %s1499_s19, 4  ;;  %s1405_s21 = int_to_ptr.vmem [resolvable:$false] %s1404_s21 }
 0x549   : > { %p1402_p4 = pnand %p1401_p2, %p1576_p3  ;;  %s1406_s14 = scalar_lea.vmem %s1405_s21, 1536 }
 0x54a   : > { %p1407_p6 = scmp.lt.s32.totalorder %s1734_s7, %s1405_s21  ;;  %p1408_p7 = scmp.lt.s32.totalorder %s1406_s14, %s1400_s13 }
 0x54b   : > { %p1403_p5 = pneg %p1402_p4 }
 0x54c   : > { %p1409_p8 = por %p1408_p7, %p1407_p6 }
 0x54e   : > { %p1410_p10 = pnand %p1409_p8, %p1403_p5 }
 0x550   : > { %1413 = shalt.err (!%p1410_p10)
}
 0x551   : > { %s1414_s23 = scalar_lea.hbm %s1732_s10, 768  ;;  %s1418_s30 = scalar_lea.hbm %s1793_s4, 1536 }
 0x552   : > { %p1415_p11 = scmp.ne.s32.totalorder %s1732_s10, %s1414_s23  ;;  %p1419_p0 = scmp.lt.s32.totalorder %s1732_s10, %s1793_s4 }
 0x553   : > { %p1420_p1 = scmp.lt.s32.totalorder %s1418_s30, %s1414_s23 }
 0x554   : > { %p1416_p12 = pnand %p1415_p11, %p1576_p3 }
 0x555   : > { %p1421_p2 = por %p1420_p1, %p1419_p0 }
 0x556   : > { %p1417_p13 = pneg %p1416_p12 }
 0x558   : > { %p1422_p4 = pnand %p1421_p2, %p1417_p13 }
 0x55a   : > { %1425 = shalt.err (!%p1422_p4)
}
 0x55b   : > { %s1500_s6 = smov 384   ;;  %s1501_s18 = smov 24  }
 0x55c   : > { %1226 = dma.vmem_to_hbm [thread:$0]  (%p1576_p3), %s1734_s7, 768, %s1732_s10, %s1738_s12, %s1500_s6, %s1500_s6, %s1501_s18  }
 0x55d PF: > { %p1232_p5 = scmp.ge.s32.totalorder %s1492_s22, 2  ;;  %s1029_s8 = sand.u32 1, %s1464_s15  }
 0x55e   : > { %s1030_s9 = scalar_lea.sflag [#allocation4], %s1029_s8 }
 0x55f   : > { %p1229_p6 = pnand %p1232_p5, %p1586_p9 }
 0x561   : > { %p1230_p7 = pneg %p1229_p6 }
 0x563   : > { %1459 = dma.done.wait (%p1230_p7), %s1030_s9, 768  }
 0x564   : > { %1461 = vsyncadd (%p1230_p7), %s1030_s9, 4294966528  ;;  %s17_s22 = sadd.s32 1, %s1492_s22   ;;  %s1803_s19 = sld [smem:[#allocation6_spill]] }
 0x565   : > { %p14_p8 = scmp.ge.s32.totalorder %s17_s22, 14   ;;  %s1804_s27 = sld [smem:[#allocation7_spill]] }
 0x566   : > { %s1805_s21 = sld [smem:[#allocation8_spill]]  ;;  %s1806_s15 = smov %s1468_s16 }
 0x567   : > { %s1807_s16 = smov %s1472_s17  ;;  %s1808_s17 = smov %s1594_s5 }
 0x568   : > { %s1809_s18 = smov %s1484_s20  ;;  %16 = sbr.rel (!%p14_p8) target bundleno = 5 (0x5), region = 85 }
 0x56b   : > { %s1810_s20 = smov %s1804_s27 }
 0x56d   :  { %1035 = vsyncpa [#allocation4], 1 }
 0x56e   :  { %1037 = vsyncpa [#allocation4 + $0x1], 1 }

</bundles_post_ra>
